<compile_context>
chip_gen: v7x
topology: tpu7x:2x2x1
jax: 0.10.0
libtpu: 0.0.40
codegen_flags: <defaults>
</compile_context>

<pallas_src>
import functools
import math

import jax
import jax.numpy as jnp
from jax import lax
from jax.experimental import pallas as pl
from jax.experimental.pallas import tpu as pltpu


# --------------------------------------------------------------------------- #
# Helpers
# --------------------------------------------------------------------------- #
def _round_up(x, m):
    return (x + m - 1) // m * m


def _sublane(dtype):
    """Minimum second-minor tile multiple for a dtype (packed sublanes)."""
    itemsize = jnp.dtype(dtype).itemsize
    return {4: 8, 2: 16, 1: 32}.get(itemsize, 8)


def _largest_tile(total, cap, align):
    """Largest d <= cap with d % align == 0 and total % d == 0.

    `total` is assumed to be a multiple of `align`; falls back to `align`.
    """
    cap = max(align, min(cap, total))
    d = (cap // align) * align
    while d > align:
        if total % d == 0:
            return d
        d -= align
    return align


def _vmem_capacity_bytes():
    try:
        return int(pltpu.get_tpu_info().vmem_capacity_bytes)
    except Exception:
        # Conservative fallback: v7x per-TensorCore VMEM.
        return 64 * 1024 * 1024


# --------------------------------------------------------------------------- #
# Kernels
# --------------------------------------------------------------------------- #
def _linear_kernel_acc(x_ref, w_ref, b_ref, o_ref, acc_ref, *, precision):
    """One (i, j, k) grid step; f32 scratch accumulator (non-f32 output dtype).

    x_ref:   (tm, tk) activation tile
    w_ref:   (tn, tk) weight tile (contraction on its LAST dim -> no transpose)
    b_ref:   (1,  tn) bias column tile
    o_ref:   (tm, tn) output tile (constant across k -> resident)
    acc_ref: (tm, tn) f32 accumulator scratch
    """
    k = pl.program_id(2)

    @pl.when(k == 0)
    def _():
        acc_ref[...] = jnp.zeros_like(acc_ref)

    acc_ref[...] += lax.dot_general(
        x_ref[...], w_ref[...],
        dimension_numbers=(((1,), (1,)), ((), ())),
        preferred_element_type=jnp.float32,
        precision=precision)

    @pl.when(k == pl.num_programs(2) - 1)
    def _():
        o_ref[...] = (acc_ref[...]
                      + b_ref[...].astype(jnp.float32)).astype(o_ref.dtype)


def _linear_kernel_f32_out(x_ref, w_ref, b_ref, o_ref, *, precision):
    """One (i, j, k) grid step; accumulate directly into the resident f32
    output tile (no scratch), bias folded into the k==0 init."""
    k = pl.program_id(2)

    @pl.when(k == 0)
    def _():
        o_ref[...] = jnp.broadcast_to(
            b_ref[...].astype(jnp.float32), o_ref.shape)

    o_ref[...] += lax.dot_general(
        x_ref[...], w_ref[...],
        dimension_numbers=(((1,), (1,)), ((), ())),
        preferred_element_type=jnp.float32,
        precision=precision)


# --------------------------------------------------------------------------- #
# Wrappers
# --------------------------------------------------------------------------- #
def prepare_linear_norm_params(weight, bias=None):
    """Pad weight/bias to 128-aligned shapes ONCE (at init time).

    Returns (w_padded[(n_p, k_p)], b_padded[(1, n_p)], out_dim, in_dim).
    Feeding these to linear_norm_prepared avoids re-padding the full weight
    in HBM on every forward call.
    """
    out_dim, in_dim = weight.shape
    n_p = _round_up(out_dim, 128)
    k_p = _round_up(in_dim, 128)

    w_p = weight
    if (n_p, k_p) != weight.shape:
        w_p = jnp.pad(weight, ((0, n_p - out_dim), (0, k_p - in_dim)))

    if bias is None:
        b_p = jnp.zeros((1, n_p), dtype=weight.dtype)
    else:
        b_p = bias.reshape(1, out_dim)
        if n_p != out_dim:
            b_p = jnp.pad(b_p, ((0, 0), (0, n_p - out_dim)))
    return w_p, b_p, out_dim, in_dim


def linear_norm_prepared(x, w_p, b_p, out_dim, in_dim, *,
                         tm_max=512, tn_max=512, tk_max=2048,
                         precision=None):
    """y = x @ W^T + b with pre-padded (128-aligned) weight/bias."""
    lead_shape = x.shape[:-1]
    assert x.shape[-1] == in_dim, (x.shape, in_dim)
    x2d = x.reshape(-1, in_dim)
    m = x2d.shape[0]

    n_base, k_base = w_p.shape                      # multiples of 128
    out_dtype = x.dtype
    use_acc = jnp.dtype(out_dtype) != jnp.dtype(jnp.float32)

    sub = _sublane(x.dtype)
    m_base = _round_up(m, sub)

    x_bytes = jnp.dtype(x.dtype).itemsize
    w_bytes = jnp.dtype(w_p.dtype).itemsize
    o_bytes = jnp.dtype(out_dtype).itemsize

    # ---- padding-aware tile selection (tiles divide the aligned dims) ----- #
    tm = _largest_tile(m_base, tm_max, sub)
    tn = _largest_tile(n_base, tn_max, 128)
    tk = _largest_tile(k_base, tk_max, 128)

    # ---- fit tiles into a generation-aware VMEM budget -------------------- #
    vmem_cap = _vmem_capacity_bytes()
    budget = int(0.75 * vmem_cap)

    def vmem_needed(tm_, tn_, tk_):
        # double-buffered inputs (x, W, bias) + double-buffered output
        need = 2 * (tm_ * tk_ * x_bytes + tn_ * tk_ * w_bytes + tn_ * w_bytes)
        need += 2 * tm_ * tn_ * o_bytes
        if use_acc:
            need += tm_ * tn_ * 4
        return need

    while (vmem_needed(tm, tn, tk) > budget
           and (tk > 128 or tn > 128 or tm > sub)):
        if tk >= max(tm, tn) and tk > 128:
            tk = _largest_tile(k_base, tk // 2, 128)
        elif tn >= tm and tn > 128:
            tn = _largest_tile(n_base, tn // 2, 128)
        elif tm > sub:
            tm = _largest_tile(m_base, max(tm // 2, sub), sub)
        else:
            break

    # ---- keep >=2 blocks on a "parallel" axis (v7x has 2 TensorCores) ----- #
    if m_base // tm == 1 and n_base // tn == 1:
        if n_base // 128 >= 2:
            tn = _largest_tile(n_base, n_base // 2, 128)
        elif m_base // sub >= 2:
            tm = _largest_tile(m_base, max(m_base // 2, sub), sub)

    # ---- pad only the activation (cheap, M x K) --------------------------- #
    x_in = x2d
    if (m_base, k_base) != x2d.shape:
        x_in = jnp.pad(x2d, ((0, m_base - m), (0, k_base - in_dim)))

    grid = (m_base // tm, n_base // tn, k_base // tk)

    if use_acc:
        kernel = functools.partial(_linear_kernel_acc, precision=precision)
        scratch_shapes = [pltpu.VMEM((tm, tn), jnp.float32)]
    else:
        kernel = functools.partial(_linear_kernel_f32_out, precision=precision)
        scratch_shapes = []

    need = vmem_needed(tm, tn, tk)
    vmem_limit = int(min(int(0.9 * vmem_cap),
                         max(need + need // 2 + (4 << 20), 32 << 20)))

    cost = pl.CostEstimate(
        flops=2 * m * out_dim * in_dim,
        transcendentals=0,
        bytes_accessed=(m * in_dim * x_bytes
                        + n_base * k_base * w_bytes
                        + n_base * w_bytes
                        + m * out_dim * o_bytes))

    out = pl.pallas_call(
        kernel,
        out_shape=jax.ShapeDtypeStruct((m_base, n_base), out_dtype),
        grid_spec=pltpu.PrefetchScalarGridSpec(
            num_scalar_prefetch=0,
            grid=grid,
            in_specs=[
                pl.BlockSpec((tm, tk), lambda i, j, k: (i, k)),   # x
                pl.BlockSpec((tn, tk), lambda i, j, k: (j, k)),   # W (untransposed)
                pl.BlockSpec((1, tn), lambda i, j, k: (0, j)),    # bias
            ],
            out_specs=pl.BlockSpec((tm, tn), lambda i, j, k: (i, j)),
            scratch_shapes=scratch_shapes,
        ),
        compiler_params=pltpu.CompilerParams(
            dimension_semantics=("parallel", "parallel", "arbitrary"),
            vmem_limit_bytes=vmem_limit),
        cost_estimate=cost,
    )(x_in, w_p, b_p)

    out = out[:m, :out_dim]
    return out.reshape(*lead_shape, out_dim)


def linear_norm(x, weight, bias=None, *, tm_max=512, tn_max=512, tk_max=2048,
                precision=None):
    """Convenience wrapper: y = x @ weight.T + bias (pads params per call).

    For repeated calls with the same parameters, prefer
    prepare_linear_norm_params() once + linear_norm_prepared() to avoid a
    weight-sized HBM pad round-trip on every forward.
    """
    w_p, b_p, out_dim, in_dim = prepare_linear_norm_params(weight, bias)
    return linear_norm_prepared(x, w_p, b_p, out_dim, in_dim,
                                tm_max=tm_max, tn_max=tn_max, tk_max=tk_max,
                                precision=precision)


# --------------------------------------------------------------------------- #
# Parameter init matching torch.nn.Linear + xavier_uniform_(gain)
# --------------------------------------------------------------------------- #
def init_linear_norm_params(key, in_dim, out_dim, w_init_gain="linear",
                            dtype=jnp.float32):
    gains = {"linear": 1.0, "relu": math.sqrt(2.0), "tanh": 5.0 / 3.0,
             "sigmoid": 1.0}
    gain = gains.get(w_init_gain, 1.0)
    k_w, k_b = jax.random.split(key)
    limit = gain * math.sqrt(6.0 / (in_dim + out_dim))
    weight = jax.random.uniform(k_w, (out_dim, in_dim), dtype=dtype,
                                minval=-limit, maxval=limit)
    b_bound = 1.0 / math.sqrt(in_dim)
    bias = jax.random.uniform(k_b, (out_dim,), dtype=dtype,
                              minval=-b_bound, maxval=b_bound)
    return weight, bias


# --------------------------------------------------------------------------- #
# Self-test
# --------------------------------------------------------------------------- #
if __name__ == "__main__":
    key = jax.random.PRNGKey(0)
    k_x, k_p, k_x2, k_p2 = jax.random.split(key, 4)

    # Small demo shape consistent with the module (batch=2, seq=8, hidden=32).
    batch, seq, in_dim, out_dim = 2, 8, 32, 32
    x = jax.random.normal(k_x, (batch, seq, in_dim), dtype=jnp.float32)
    weight, bias = init_linear_norm_params(k_p, in_dim, out_dim,
                                           w_init_gain="linear")
    # Pre-padded parameter path (no per-call weight re-pad in HBM).
    w_p, b_p, od, idm = prepare_linear_norm_params(weight, bias)
    y = jax.block_until_ready(linear_norm_prepared(x, w_p, b_p, od, idm))
    y_ref = x @ weight.T + bias
    assert y.shape == (batch, seq, out_dim)
    assert jnp.allclose(y, y_ref, atol=1e-2, rtol=1e-2), (
        float(jnp.max(jnp.abs(y - y_ref))))

    # Larger ragged shape: exercises multi-block N, padding-aware tiles
    # (384 / 1152 tiles -> no wasted zero blocks) and the convenience wrapper.
    # MXU default precision (bf16 passes) on both sides -> loose tolerance.
    b2, s2, in2, out2 = 2, 40, 1152, 384
    x2 = jax.random.normal(k_x2, (b2, s2, in2), dtype=jnp.float32)
    w2, bb2 = init_linear_norm_params(k_p2, in2, out2, w_init_gain="relu")
    y2 = jax.block_until_ready(linear_norm(x2, w2, bb2))
    y2_ref = x2 @ w2.T + bb2
    assert y2.shape == (b2, s2, out2)
    assert jnp.allclose(y2, y2_ref, atol=3e-2, rtol=3e-2), (
        float(jnp.max(jnp.abs(y2 - y2_ref))))

    print("KERNEL_OK")
</pallas_src>

<mosaic_0001>
module attributes {stable_mosaic.version = 11 : i64} {
  func.func @_linear_kernel_f32_out(%arg0: i32, %arg1: i32, %arg2: i32, %arg3: memref<8x128xf32, #tpu.memory_space<vmem>>, %arg4: memref<128x128xf32, #tpu.memory_space<vmem>>, %arg5: memref<1x128xf32, #tpu.memory_space<vmem>>, %arg6: memref<8x128xf32, #tpu.memory_space<vmem>>) attributes {dimension_semantics = [#tpu.dimension_semantics<parallel>, #tpu.dimension_semantics<parallel>, #tpu.dimension_semantics<arbitrary>], iteration_bounds = array<i64: 2, 1, 1>, scalar_prefetch = 0 : i64, scratch_operands = 0 : i64, tpu.core_type = #tpu.core_type<tc>, window_params = [{transform_indices = @transform_0, window_bounds = array<i64: 8, 128>}, {transform_indices = @transform_1, window_bounds = array<i64: 128, 128>}, {transform_indices = @transform_2, window_bounds = array<i64: 1, 128>}, {transform_indices = @transform_3, window_bounds = array<i64: 8, 128>}]} {
    %c0_i32 = arith.constant 0 : i32
    %0 = arith.cmpi eq, %arg2, %c0_i32 : i32
    %1 = arith.extui %0 : i1 to i32
    %c0_i32_0 = arith.constant 0 : i32
    %2 = arith.cmpi ne, %1, %c0_i32_0 : i32
    scf.if %2 {
      %c0_8 = arith.constant 0 : index
      %c0_9 = arith.constant 0 : index
      %9 = vector.load %arg5[%c0_8, %c0_9] : memref<1x128xf32, #tpu.memory_space<vmem>>, vector<1x128xf32>
      %10 = vector.shape_cast %9 : vector<1x128xf32> to vector<1x128xf32>
      %11 = vector.broadcast %10 : vector<1x128xf32> to vector<8x128xf32>
      %c0_10 = arith.constant 0 : index
      %c0_11 = arith.constant 0 : index
      %12 = vector.load %arg6[%c0_10, %c0_11] : memref<8x128xf32, #tpu.memory_space<vmem>>, vector<8x128xf32>
      tpu.vector_store %arg6[%c0_10, %c0_11], %11 {strides = array<i32>} : memref<8x128xf32, #tpu.memory_space<vmem>>, vector<8x128xf32>,
    } else {
    }
    %c0 = arith.constant 0 : index
    %c0_1 = arith.constant 0 : index
    %3 = vector.load %arg6[%c0, %c0_1] : memref<8x128xf32, #tpu.memory_space<vmem>>, vector<8x128xf32>
    %c0_2 = arith.constant 0 : index
    %c0_3 = arith.constant 0 : index
    %4 = vector.load %arg3[%c0_2, %c0_3] : memref<8x128xf32, #tpu.memory_space<vmem>>, vector<8x128xf32>
    %c0_4 = arith.constant 0 : index
    %c0_5 = arith.constant 0 : index
    %5 = vector.load %arg4[%c0_4, %c0_5] : memref<128x128xf32, #tpu.memory_space<vmem>>, vector<128x128xf32>
    %cst = arith.constant dense<0.000000e+00> : vector<8x128xf32>
    %6 = tpu.matmul %4, %5, %cst {dimension_numbers = #tpu.dot_dimension_numbers<[1], [1], [0], [0], [0, 0, 1, 0], [], []>} : vector<8x128xf32>, vector<128x128xf32>, vector<8x128xf32> -> vector<8x128xf32>
    %7 = arith.addf %3, %6 : vector<8x128xf32>
    %c0_6 = arith.constant 0 : index
    %c0_7 = arith.constant 0 : index
    %8 = vector.load %arg6[%c0_6, %c0_7] : memref<8x128xf32, #tpu.memory_space<vmem>>, vector<8x128xf32>
    tpu.vector_store %arg6[%c0_6, %c0_7], %7 {strides = array<i32>} : memref<8x128xf32, #tpu.memory_space<vmem>>, vector<8x128xf32>,
    return
  }
  func.func @transform_0(%arg0: i32, %arg1: i32, %arg2: i32) -> (i32, i32) {
    %c0_i32 = arith.constant 0 : i32
    return %arg0, %arg2 : i32, i32
  }
  func.func @transform_1(%arg0: i32, %arg1: i32, %arg2: i32) -> (i32, i32) {
    %c0_i32 = arith.constant 0 : i32
    return %arg1, %arg2 : i32, i32
  }
  func.func @transform_2(%arg0: i32, %arg1: i32, %arg2: i32) -> (i32, i32) {
    %c0_i32 = arith.constant 0 : i32
    %c0_i32_0 = arith.constant 0 : i32
    return %c0_i32, %arg1 : i32, i32
  }
  func.func @transform_3(%arg0: i32, %arg1: i32, %arg2: i32) -> (i32, i32) {
    %c0_i32 = arith.constant 0 : i32
    return %arg0, %arg1 : i32, i32
  }
}

</mosaic_0001>

<bundles_post_ra>
// kernel: tpu_custom_call.1
= control target key start
LH: loop header
LB: loop body
LE: loop exit
PB: predicated region body
PF: predicated region fallthrough
CT: control target
= control target key end

     0   :  { %8 = vsyncpa [#allocation3], 0  ;;  %s1046_s0 = inlined_call_operand.hbm [shape: f32[16,128], index: 0, kind: input, shape index: {}]   ;;  %s1047_s1 = inlined_call_operand.hbm [shape: f32[128,128], index: 1, kind: input, shape index: {}]   ;;  %s1048_s2 = inlined_call_operand.vmem [shape: f32[1,128], index: 2, kind: input, shape index: {}]   ;;  %s1049_s3 = inlined_call_operand.hbm [shape: f32[16,128], index: 3, kind: output, shape index: {}]  }
   0x1   :  { %10 = vsyncpa [#allocation3 + $0x1], 0 }
   0x2   :  { %11 = vsyncpa [#allocation6], 0 }
   0x3   :  { %12 = vsyncpa [#allocation4], 0 }
   0x4   :  { %14 = vsyncpa [#allocation4 + $0x1], 0  ;;  %s822_s12 = smov 0   ;;  %s824_s13 = smov 0  }
   0x5   :  { %s826_s14 = smov 0   ;;  %s828_s15 = smov 0  }
   0x6   :  { %s830_s16 = smov 0   ;;  %s832_s17 = smov 0  }
   0x7 LB: > { %s477_s18 = sadd.s32 4294967295, %s792_s17   ;;  %s478_s19 = sadd.s32 4294967294, %s792_s17   ;;  %s792_s17 = sphi %s832_s17, %s20_s17   ;;  %s788_s16 = sphi %s830_s16, %s1073_s16   ;;  %s784_s15 = sphi %s828_s15, %s1072_s15   ;;  %s780_s14 = sphi %s826_s14, %s1071_s14   ;;  %s776_s13 = sphi %s824_s13, %s1070_s13   ;;  %s772_s12 = sphi %s822_s12, %s1069_s12  }
   0x8   : > { %p61_p0 = scmp.ne.s32.totalorder %s776_s13, %s772_s12  ;;  %p856_p1 = scmp.eq.s32.totalorder %s477_s18, 0 }
   0x9   : > { %p860_p2 = scmp.eq.s32.totalorder %s477_s18, 1  ;;  %p147_p3 = scmp.eq.s32.totalorder %s478_s19, 1 }
   0xa   : > { %s1054_s20 = scalar_select %p856_p1, 1, 0 }
   0xb   : > { %s1055_s21 = scalar_select %p860_p2, 1, 0 }
   0xc   : > { %p866_p4 = por %p856_p1, %p61_p0  ;;  %p479_p5 = scmp.ge.s32.totalorder %s792_s17, 1 }
   0xd   : > { %p871_p6 = por %p147_p3, %p61_p0  ;;  %p154_p7 = scmp.lt.s32.totalorder %s792_s17, 3 }
   0xe   : > { %s1056_s22 = scalar_select %p866_p4, 1, 0 }
   0xf   : > { %s1057_s23 = scalar_select %p871_p6, 1, 0 }
  0x10   : > { %p876_p8 = pnand %p479_p5, %p154_p7  ;;  %s794_s25 = smov [#allocation5]  }
  0x11   : > { %s170_s26 = sshll.u32 %s794_s25, 4  ;;  %s39_s28 = sadd.s32 1, %s788_s16  ;;  %s171_s26 = int_to_ptr.vmem [resolvable:$true] %s170_s26 }
  0x12   : > { %s1058_s24 = scalar_select %p876_p8, 1, 0 }
  0x13   : > { %p578_p9 = pneg %p876_p8  ;;  %s648_s4 = scalar_lea.hbm %s1047_s1, 2048 }
  0x14   : > { %p649_p12 = scmp.ne.s32.totalorder %s1047_s1, %s648_s4  ;;  %p655_p5 = scmp.lt.u32.totalorder %s648_s4, %s1047_s1 }
  0x15   : > { %p885_p11 = pnand %p578_p9, %p856_p1 }
  0x17   : > { %p650_p13 = pneg %p885_p11 }
  0x19   : > { %p651_p0 = pnand %p650_p13, %p649_p12 }
  0x1b   : > { %p652_p3 = pneg %p651_p0 }
  0x1d   : > { %p657_p7 = pnand %p655_p5, %p652_p3 }
  0x1f   : > { %660 = shalt.err (!%p657_p7)
}
  0x20   : > { %s661_s9 = scalar_lea.vmem %s171_s26, 2048  ;;  %p669_p1 = scmp.lt.s32.totalorder %s171_s26, %s171_s26 }
  0x21   : > { %p662_p9 = scmp.ne.s32.totalorder %s171_s26, %s661_s9  ;;  %p670_p4 = scmp.lt.s32.totalorder %s661_s9, %s661_s9 }
  0x23   : > { %p664_p10 = pnand %p662_p9, %p650_p13  ;;  %p671_p8 = por %p670_p4, %p669_p1 }
  0x25   : > { %p665_p6 = pneg %p664_p10 }
  0x27   : > { %p672_p2 = pnand %p671_p8, %p665_p6 }
  0x29   : > { %675 = shalt.err (!%p672_p2)
}
  0x2a   : > { %s795_s10 = smov 128   ;;  %s796_s11 = smov 8  }
  0x2b   : > { %581 = dma.hbm_to_vmem [thread:$0]  (!%p885_p11), %s1047_s1, 2048, %s171_s26, [#allocation6], %s795_s10, %s795_s10, %s796_s11  }
  0x2c   : > { %p41_p1 = scmp.ge.s32.totalorder %s39_s28, 2  ;;  %s48_s25 = sadd.s32 1, %s780_s14 }
  0x2d   : > { %p55_p2 = scmp.ne.s32.totalorder %s780_s14, %s776_s13  ;;  %p56_p4 = scmp.eq.s32.totalorder %s792_s17, 0 }
  0x2e   : > { %s1075_s28 = smov (%p41_p1, %s39_s28), 0  ;;  %p1061_p8 = scmp.ne.s32.totalorder %s1055_s21, 0 }
  0x2f   : > { %p912_p6 = por %p56_p4, %p55_p2  ;;  %s43_s27 = ssub.s32 %s788_s16, %s1075_s28 }
  0x30   : > { %p918_p10 = por %p1061_p8, %p55_p2  ;;  %p591_p12 = scmp.lt.s32.totalorder %s792_s17, 2 }
  0x31   : > { %p46_p11 = scmp.eq.s32.totalorder %s43_s27, 0  ;;  %s190_s26 = sand.u32 1, %s780_s14  }
  0x32   : > { %s483_s4 = sshll.u32 %s190_s26, 3  ;;  %s484_s6 = sshll.u32 %s788_s16, 7 }
  0x33   : > { %s927_s5 = scalar_select %p46_p11, %s780_s14, %s48_s25  }
  0x34   : > { %s933_s9 = scalar_lea.hbm %s1046_s0, %s484_s6  ;;  %s194_s21 = scalar_lea.vmem [#allocation2], %s483_s4 }
  0x35   : > { %s202_s10 = sshll.u32 %s194_s21, 4  ;;  %p939_p13 = pnand %p591_p12, %p912_p6  ;;  %s935_s10 = int_to_ptr.vmem [resolvable:$true] %s202_s10 }
  0x36   : > { %s191_s18 = scalar_lea.sflag [#allocation3], %s190_s26  ;;  %s676_s19 = scalar_lea.hbm %s933_s9, 128 }
  0x37   : > { %p677_p0 = scmp.ne.s32.totalorder %s933_s9, %s676_s19  ;;  %p678_p3 = pneg %p939_p13 }
  0x38   : > { %s681_s4 = scalar_lea.hbm %s1046_s0, 256  ;;  %p682_p9 = scmp.lt.u32.totalorder %s933_s9, %s1046_s0 }
  0x39   : > { %p679_p5 = pnand %p678_p3, %p677_p0  ;;  %p683_p1 = scmp.lt.u32.totalorder %s681_s4, %s676_s19 }
  0x3a   : > { %p685_p4 = scmp.lt.u32.totalorder %s676_s19, %s933_s9 }
  0x3b   : > { %p680_p7 = pneg %p679_p5  ;;  %p684_p2 = por %p683_p1, %p682_p9 }
  0x3d   : > { %p686_p6 = por %p685_p4, %p684_p2 }
  0x3f   : > { %p687_p8 = pnand %p686_p6, %p680_p7 }
  0x41   : > { %690 = shalt.err (!%p687_p8)
}
  0x42   : > { %s691_s26 = scalar_lea.vmem %s935_s10, 128  ;;  %s797_s7 = smov [#allocation2]  }
  0x43   : > { %p692_p12 = scmp.ne.s32.totalorder %s935_s10, %s691_s26  ;;  %s696_s8 = sshll.u32 %s797_s7, 4  ;;  %s697_s8 = int_to_ptr.vmem [resolvable:$false] %s696_s8 }
  0x44   : > { %s698_s21 = scalar_lea.vmem %s697_s8, 256  ;;  %p699_p5 = scmp.lt.s32.totalorder %s935_s10, %s697_s8 }
  0x45   : > { %p694_p11 = pnand %p692_p12, %p678_p3  ;;  %p700_p9 = scmp.lt.s32.totalorder %s698_s21, %s691_s26 }
  0x47   : > { %p695_p0 = pneg %p694_p11  ;;  %p701_p1 = por %p700_p9, %p699_p5 }
  0x49   : > { %p702_p2 = pnand %p701_p1, %p695_p0 }
  0x4b   : > { %705 = shalt.err (!%p702_p2)
}
  0x4c   : > { %585 = dma.hbm_to_vmem [thread:$0]  (!%p939_p13), %s933_s9, 128, %s935_s10, %s191_s18  }
  0x4d   : > { %p1064_p7 = scmp.ne.s32.totalorder %s1058_s24, 0 }
  0x4e   : > { %s971_s19 = sand.u32 (!%p1064_p7), 1, %s776_s13   ;;  %p1065_p3 = scmp.ne.s32.totalorder (!%p1064_p7), %s1056_s22, 0 }
  0x4f   : > { %211 = sbr.rel (%p1064_p7) target bundleno = 385 (0x181), region = 32  ;;  %s486_s25 = sshll.u32 (!%p1064_p7), %s971_s19, 3 }
  0x50   : > { %s214_s27 = scalar_lea.sflag (!%p1064_p7), [#allocation3], %s971_s19  ;;  %s977_s4 = scalar_lea.vmem (!%p1064_p7), [#allocation2], %s486_s25 }
  0x56   : > { %759 = dma.done.wait (%p1065_p3), %s214_s27, 128  }
  0x57   : > { %761 = vsyncadd (%p1065_p3), %s214_s27, 4294967168  ;;  %p1066_p13 = scmp.ne.s32.totalorder %s1054_s20, 0 }
  0x59   : > { %763 = dma.done.wait (%p1066_p13), [#allocation6], 2048  }
  0x5a   : > { %765 = vsyncadd (%p1066_p13), [#allocation6], 4294965248  ;;  %v798_v0 = vmov 0.0|0.0   ;;  %vm799_vm0 = vmmov 0   ;;  %v800_v1 = vmov 0.0   ;;  %v265_v2 = vld [vmem:[#allocation5] sm:$0xff] }
  0x5b   : > { %546 = vmatprep.subr.bf16.mxu0 %v798_v0  ;;  %543 = vmatprep.mubr.msk.f32.mxu0 %vm799_vm0, %v800_v1  ;;  %v266_v3 = vld [vmem:[#allocation5 + $0x8] sm:$0xff]  ;;  %v267_v5 = vld [vmem:[#allocation5 + $0x10] sm:$0xff]  ;;  %v268_v6 = vld [vmem:[#allocation5 + $0x18] sm:$0xff]  ;;  %s491_s24 = sshll.u32 %s784_s15, 7  ;;  %s246_s9 = scalar_lea.vmem [#allocation7], %s486_s25 }
  0x5c   : > { %v547_v4 = vpack.c.bf16 %v266_v3, %v265_v2  ;;  %v550_v7 = vpack.c.bf16 %v268_v6, %v267_v5  ;;  %v269_v8 = vld [vmem:[#allocation5 + $0x20] sm:$0xff]  ;;  %v270_v9 = vld [vmem:[#allocation5 + $0x28] sm:$0xff]  ;;  %v271_v11 = vld [vmem:[#allocation5 + $0x30] sm:$0xff]  ;;  %s368_s10 = sshll.u32 %s246_s9, 4  ;;  %s997_s29 = scalar_lea.hbm %s1049_s3, %s491_s24  ;;  %s999_s10 = int_to_ptr.vmem [resolvable:$true] %s368_s10 }
  0x5d   : > { %v553_v10 = vpack.c.bf16 %v270_v9, %v269_v8  ;;  %v272_v12 = vld [vmem:[#allocation5 + $0x38] sm:$0xff]  ;;  %v273_v14 = vld [vmem:[#allocation5 + $0x40] sm:$0xff]  ;;  %v274_v15 = vld [vmem:[#allocation5 + $0x48] sm:$0xff]  ;;  %s354_s6 = scalar_lea.sflag [#allocation4], %s971_s19  ;;  %s706_s26 = scalar_lea.vmem %s999_s10, 128 }
  0x5e   : > { %548 = vmatpush3.bf16.xpose.msra.mxu0 %v547_v4  ;;  %v556_v13 = vpack.c.bf16 %v272_v12, %v271_v11  ;;  %v559_v16 = vpack.c.bf16 %v274_v15, %v273_v14  ;;  %v275_v17 = vld [vmem:[#allocation5 + $0x50] sm:$0xff]  ;;  %v276_v18 = vld [vmem:[#allocation5 + $0x58] sm:$0xff]  ;;  %v277_v20 = vld [vmem:[#allocation5 + $0x60] sm:$0xff]  ;;  %p707_p4 = scmp.ne.s32.totalorder %s999_s10, %s706_s26  ;;  %s801_s15 = smov [#allocation7]  }
  0x5f   : > { %549 = vmatprep.subr.bf16.mxu0 %v798_v0  ;;  %v562_v19 = vpack.c.bf16 %v276_v18, %v275_v17  ;;  %v278_v21 = vld [vmem:[#allocation5 + $0x68] sm:$0xff]  ;;  %v279_v23 = vld [vmem:[#allocation5 + $0x70] sm:$0xff]  ;;  %v280_v24 = vld [vmem:[#allocation5 + $0x78] sm:$0xff]  ;;  %s710_s7 = sshll.u32 %s801_s15, 4  ;;  %s711_s7 = int_to_ptr.vmem [resolvable:$false] %s710_s7 }
  0x60   : > { %v565_v22 = vpack.c.bf16 %v278_v21, %v277_v20  ;;  %v568_v25 = vpack.c.bf16 %v280_v24, %v279_v23  ;;  %v264_v26 = vld [vmem:[%s977_s4] sm:$0xff]  ;;  %p708_p6 = pnand %p707_p4, %p918_p10  ;;  %s712_s8 = scalar_lea.vmem %s711_s7, 256 }
  0x61   : > { %v489_v27 = vld [vmem:[%s1048_s2] ss:$0 sm:$0xff]  ;;  %p713_p12 = scmp.lt.s32.totalorder %s999_s10, %s711_s7  ;;  %p714_p11 = scmp.lt.s32.totalorder %s712_s8, %s706_s26 }
  0x62   : > { %p709_p8 = pneg %p708_p6 }
  0x63   : > { %p715_p0 = por %p714_p11, %p713_p12 }
  0x65   : > { %p716_p5 = pnand %p715_p0, %p709_p8 }
  0x66   : > { %551 = vmatpush3.bf16.xpose.msra.mxu0 %v550_v7 }
  0x67   : > { %552 = vmatprep.subr.bf16.mxu0 %v798_v0 }
  0x6e   : > { %554 = vmatpush3.bf16.xpose.msra.mxu0 %v553_v10 }
  0x6f   : > { %555 = vmatprep.subr.bf16.mxu0 %v798_v0 }
  0x76   : > { %557 = vmatpush3.bf16.xpose.msra.mxu0 %v556_v13 }
  0x77   : > { %558 = vmatprep.subr.bf16.mxu0 %v798_v0 }
  0x7e   : > { %560 = vmatpush3.bf16.xpose.msra.mxu0 %v559_v16 }
  0x7f   : > { %561 = vmatprep.subr.bf16.mxu0 %v798_v0 }
  0x86   : > { %563 = vmatpush3.bf16.xpose.msra.mxu0 %v562_v19 }
  0x87   : > { %564 = vmatprep.subr.bf16.mxu0 %v798_v0 }
  0x8e   : > { %566 = vmatpush3.bf16.xpose.msra.mxu0 %v565_v22 }
  0x8f   : > { %567 = vmatprep.subr.bf16.mxu0 %v798_v0 }
  0x96   : > { %569 = vmatpush3.bf16.xpose.msra.mxu0 %v568_v25 }
  0x9d   : > { %544 = vmatmul.mubr.f32.vlgmr.msra.gmra.mrb[0].mxu0 %v264_v26 }
 0x170   : > { %v347_v28 = vpop.f32.mrb[0].mxu0 }
 0x171   : > { %v351_v29 = vadd.f32 %v489_v27, %v347_v28  ;;  %v545_v30 = vpop.f32.mrb[1].mxu0 }
 0x173   : > { %352 = vst [vmem:[%s246_s9] sm:$0xff] %v351_v29 }
 0x174   : > { %719 = shalt.err (!%p716_p5)
}
 0x175   : > { %s720_s21 = scalar_lea.hbm %s997_s29, 128  ;;  %s724_s27 = scalar_lea.hbm %s1049_s3, 256 }
 0x176   : > { %p721_p9 = scmp.ne.s32.totalorder %s997_s29, %s720_s21  ;;  %p725_p7 = scmp.lt.u32.totalorder %s997_s29, %s1049_s3 }
 0x177   : > { %p726_p3 = scmp.lt.u32.totalorder %s724_s27, %s720_s21  ;;  %p728_p4 = scmp.lt.u32.totalorder %s720_s21, %s997_s29 }
 0x178   : > { %p722_p1 = pnand %p721_p9, %p918_p10 }
 0x179   : > { %p727_p13 = por %p726_p3, %p725_p7 }
 0x17a   : > { %p723_p2 = pneg %p722_p1 }
 0x17b   : > { %p729_p6 = por %p728_p4, %p727_p13 }
 0x17d   : > { %p730_p8 = pnand %p729_p6, %p723_p2 }
 0x17f   : > { %733 = shalt.err (!%p730_p8)
}
 0x180   : > { %576 = dma.vmem_to_hbm [thread:$0]  (%p918_p10), %s999_s10, 128, %s997_s29, %s354_s6  }
 0x181 PF: > { %s380_s22 = sand.u32 1, %s772_s12   ;;  %p1067_p12 = scmp.ne.s32.totalorder %s1057_s23, 0 }
 0x182   : > { %p1068_p11 = scmp.ge.s32.totalorder %s792_s17, 2  ;;  %s381_s24 = scalar_lea.sflag [#allocation4], %s380_s22 }
 0x184   : > { %p587_p0 = pnand %p1068_p11, %p1067_p12 }
 0x186   : > { %767 = dma.done.wait (!%p587_p0), %s381_s24, 128  }
 0x187   : > { %769 = vsyncadd (!%p587_p0), %s381_s24, 4294967168  ;;  %s20_s17 = sadd.s32 1, %s792_s17   ;;  %s1069_s12 = smov %s776_s13 }
 0x188   : > { %p17_p5 = scmp.ge.s32.totalorder %s20_s17, 4   ;;  %s1070_s13 = smov %s780_s14 }
 0x189   : > { %s1071_s14 = smov %s927_s5  ;;  %s1072_s15 = smov %s788_s16 }
 0x18a   : > { %s1073_s16 = smov %s1075_s28  ;;  %19 = sbr.rel (!%p17_p5) target bundleno = 7 (0x7), region = 89 }
 0x191   :  { %386 = vsyncpa [#allocation3], 1 }
 0x192   :  { %388 = vsyncpa [#allocation3 + $0x1], 1 }
 0x193   :  { %389 = vsyncpa [#allocation6], 1 }
 0x194   :  { %390 = vsyncpa [#allocation4], 1 }
 0x195   :  { %392 = vsyncpa [#allocation4 + $0x1], 1 }

</bundles_post_ra>
